<compile_context>
chip_gen: v7x
topology: tpu7x:2x2x1
jax: 0.10.0
libtpu: 0.0.40
codegen_flags: <defaults>
</compile_context>

<pallas_src>
import jax
import jax.numpy as jnp
from jax import lax
from jax.experimental import pallas as pl
from jax.experimental.pallas import tpu as pltpu


# ----------------------------------------------------------------------------
# Pallas kernel: fused BiLSTM (both directions) + masked max-pool over time
#                + the SMM_p elementwise max between the c1 / c2 halves.
# ----------------------------------------------------------------------------
def smm_p_kernel(x_ref, lens_ref, wih_ref, whh_f_ref, whh_b_ref, b_ref,
                 h0_ref, c0_ref, out_ref, xg_ref):
    TB, _ = x_ref.shape                 # TB = T * BP (time-major, flattened)
    BP = lens_ref.shape[0]              # sublane-padded stacked batch (>= 2B)
    T = TB // BP
    H = whh_f_ref.shape[0]
    H4 = 4 * H
    B = out_ref.shape[0]
    NEG = jnp.float32(-1e18)

    # ---- Hoisted input projection: one MXU matmul for both directions ------
    # (T*BP, E) @ (E, 8H) + bias, stored to VMEM scratch. Replaces 2*T tiny
    # per-step matmuls inside the serial recurrence.
    xg_ref[...] = (jnp.dot(x_ref[...], wih_ref[...],
                           preferred_element_type=jnp.float32) + b_ref[...])

    # Hoist weights / lengths / initial states out of the time loop.
    whh_f = whh_f_ref[...]              # (H, 4H)
    whh_b = whh_b_ref[...]              # (H, 4H)
    lens = lens_ref[...]                # (BP, 1) int32

    h0f = jnp.broadcast_to(h0_ref[0:1, :], (BP, H))
    c0f = jnp.broadcast_to(c0_ref[0:1, :], (BP, H))
    h0b = jnp.broadcast_to(h0_ref[1:2, :], (BP, H))
    c0b = jnp.broadcast_to(c0_ref[1:2, :], (BP, H))
    mx0 = jnp.full((BP, H), NEG, jnp.float32)

    def gates_to_hc(gates, c):
        # PyTorch gate order i, f, g, o.  (H=32 gate slices are sub-128-lane;
        # acceptable at this size — with production H>=128 they become full
        # lane tiles.)
        i_g = jax.nn.sigmoid(gates[:, 0 * H:1 * H])
        f_g = jax.nn.sigmoid(gates[:, 1 * H:2 * H])
        g_g = jnp.tanh(gates[:, 2 * H:3 * H])
        o_g = jax.nn.sigmoid(gates[:, 3 * H:4 * H])
        c_new = f_g * c + i_g * g_g
        h_new = o_g * jnp.tanh(c_new)
        return h_new, c_new

    def body(t, carry):
        hf, cf, mxf, hb, cb, mxb = carry
        tb = T - 1 - t
        rf = pl.multiple_of(t * BP, BP)       # sublane-aligned dynamic starts
        rb = pl.multiple_of(tb * BP, BP)
        gin_f = xg_ref[pl.ds(rf, BP), :]      # (BP, 8H) precomputed gates @ t
        gin_b = xg_ref[pl.ds(rb, BP), :]      # (BP, 8H) precomputed gates @ tb

        # Both direction chains advance in the same iteration (independent),
        # so the per-step critical path is one small recurrent matmul each.
        gf = gin_f[:, 0:H4] + jnp.dot(hf, whh_f,
                                      preferred_element_type=jnp.float32)
        gb = gin_b[:, H4:2 * H4] + jnp.dot(hb, whh_b,
                                           preferred_element_type=jnp.float32)
        hfn, cfn = gates_to_hc(gf, cf)
        hbn, cbn = gates_to_hc(gb, cb)

        vf = t < lens                         # (BP, 1) bool, broadcasts over H
        vb = tb < lens
        hf2 = jnp.where(vf, hfn, hf)          # packed-sequence semantics:
        cf2 = jnp.where(vf, cfn, cf)          # state frozen past seq length
        hb2 = jnp.where(vb, hbn, hb)
        cb2 = jnp.where(vb, cbn, cb)
        mxf2 = jnp.maximum(mxf, jnp.where(vf, hfn, NEG))   # mask_fill(-1e18)
        mxb2 = jnp.maximum(mxb, jnp.where(vb, hbn, NEG))   # before the pool
        return hf2, cf2, mxf2, hb2, cb2, mxb2

    _, _, mxf, _, _, mxb = lax.fori_loop(
        0, T, body, (h0f, c0f, mx0, h0b, c0b, mx0))

    # Fused SMM_p max: rows [0:B] are c1, rows [B:2B] are c2.  Direct slab
    # writes (forward half / backward half); no concatenate / relayout.
    out_ref[:, 0:H] = jnp.maximum(mxf[0:B, :], mxf[B:2 * B, :])
    out_ref[:, H:2 * H] = jnp.maximum(mxb[0:B, :], mxb[B:2 * B, :])


# ----------------------------------------------------------------------------
# Wrapper: embedding gather (glue) + single fused Pallas call.
# ----------------------------------------------------------------------------
def smm_p_forward(params, c1_tokens, c1_lens, c2_tokens, c2_lens):
    B, T1 = c1_tokens.shape
    _, T2 = c2_tokens.shape
    T = max(T1, T2)
    H = params["init_h"].shape[-1]
    E = params["emb"].shape[-1]

    def pad_t(tok):
        return jnp.pad(tok, ((0, 0), (0, T - tok.shape[1])))

    # Stack c1 and c2 on the batch axis so one kernel call encodes both.
    tokens = jnp.concatenate([pad_t(c1_tokens), pad_t(c2_tokens)], axis=0)
    lens = jnp.concatenate([c1_lens, c2_lens], axis=0).astype(jnp.int32)

    # Pad stacked batch to a sublane multiple (8): aligned (8,*) tiles and
    # aligned pl.ds starts in-kernel. Padded rows have length 0 and encode to
    # -1e18 (never selected by any max).
    BP = ((2 * B + 7) // 8) * 8
    tokens = jnp.pad(tokens, ((0, BP - 2 * B), (0, 0)))
    lens = jnp.pad(lens, ((0, BP - 2 * B),))

    # Embedding gather (glue), time-major, flattened for the hoisted matmul.
    x = params["emb"][tokens].astype(jnp.float32)          # (BP, T, E)
    x = jnp.transpose(x, (1, 0, 2)).reshape(T * BP, E)     # (T*BP, E)

    # Direction-concatenated, pre-transposed input weights (E, 8H) with the
    # combined biases folded into one (1, 8H) row; recurrent weights (H, 4H).
    wih_cat = jnp.concatenate(
        [params["w_ih_f"].T, params["w_ih_b"].T], axis=1).astype(jnp.float32)
    b_cat = jnp.concatenate(
        [params["b_ih_f"] + params["b_hh_f"],
         params["b_ih_b"] + params["b_hh_b"]])[None, :].astype(jnp.float32)
    whh_f = params["w_hh_f"].T.astype(jnp.float32)
    whh_b = params["w_hh_b"].T.astype(jnp.float32)
    h0 = params["init_h"].astype(jnp.float32)              # (2, H)
    c0 = params["init_c"].astype(jnp.float32)              # (2, H)

    vmem = pl.BlockSpec(memory_space=pltpu.MemorySpace.VMEM)
    # TODO(synk): for production T/B, tile the time axis with a grid axis
    # ("arbitrary") + VMEM-scratch state carries, and add a parallel batch
    # grid axis so v7x can shard across its 2 TensorCores; unnecessary at
    # these demo shapes (entire working set is a few tiles of VMEM).
    out = pl.pallas_call(
        smm_p_kernel,
        out_shape=jax.ShapeDtypeStruct((B, 2 * H), jnp.float32),
        in_specs=[vmem] * 8,
        out_specs=vmem,
        scratch_shapes=[pltpu.VMEM((T * BP, 8 * H), jnp.float32)],
    )(x, lens[:, None], wih_cat, whh_f, whh_b, b_cat, h0, c0)
    return out


# ----------------------------------------------------------------------------
# Pure-JAX reference (mirrors PyTorch packed BiLSTM + mask_fill + max pool).
# Reference matmuls use HIGHEST precision so it is the "exact" f32 answer.
# ----------------------------------------------------------------------------
def _ref_lstm_dir(x_emb, lengths, wih, whh, b_ih, b_hh, h0, c0, reverse):
    B, T, _ = x_emb.shape
    H = h0.shape[-1]
    h = jnp.broadcast_to(h0[None, :], (B, H))
    c = jnp.broadcast_to(c0[None, :], (B, H))
    mx = jnp.full((B, H), -1e18, jnp.float32)
    steps = range(T - 1, -1, -1) if reverse else range(T)
    for t in steps:
        x_t = x_emb[:, t, :]
        m = (t < lengths)[:, None]
        gates = (jnp.dot(x_t, wih.T, precision=lax.Precision.HIGHEST)
                 + jnp.dot(h, whh.T, precision=lax.Precision.HIGHEST)
                 + b_ih + b_hh)
        i_g = jax.nn.sigmoid(gates[:, :H])
        f_g = jax.nn.sigmoid(gates[:, H:2 * H])
        g_g = jnp.tanh(gates[:, 2 * H:3 * H])
        o_g = jax.nn.sigmoid(gates[:, 3 * H:])
        c_new = f_g * c + i_g * g_g
        h_new = o_g * jnp.tanh(c_new)
        h = jnp.where(m, h_new, h)
        c = jnp.where(m, c_new, c)
        mx = jnp.maximum(mx, jnp.where(m, h_new, -1e18))
    return mx


def _ref_encode(params, tokens, lengths):
    x_emb = params["emb"][tokens].astype(jnp.float32)
    mx_f = _ref_lstm_dir(x_emb, lengths, params["w_ih_f"], params["w_hh_f"],
                         params["b_ih_f"], params["b_hh_f"],
                         params["init_h"][0], params["init_c"][0], reverse=False)
    mx_b = _ref_lstm_dir(x_emb, lengths, params["w_ih_b"], params["w_hh_b"],
                         params["b_ih_b"], params["b_hh_b"],
                         params["init_h"][1], params["init_c"][1], reverse=True)
    return jnp.concatenate([mx_f, mx_b], axis=-1)


def _ref_smm_p(params, c1_tokens, c1_lens, c2_tokens, c2_lens):
    return jnp.maximum(_ref_encode(params, c1_tokens, c1_lens),
                       _ref_encode(params, c2_tokens, c2_lens))


# ----------------------------------------------------------------------------
if __name__ == "__main__":
    # Small synthetic configuration (deterministic init, no checkpoint load).
    VOCAB, E, H = 20, 16, 32          # emb_dim=16, hidden_dim=32 -> output 2H=64
    B, T1, T2 = 2, 8, 6

    key = jax.random.PRNGKey(0)
    ks = jax.random.split(key, 16)

    def u(k, shape, s):
        return jax.random.uniform(k, shape, jnp.float32, minval=-s, maxval=s)

    params = {
        "emb":    u(ks[0], (VOCAB, E), 0.5),       # nn.Embedding.from_pretrained
        # PyTorch LSTM parameter shapes: weight_ih (4H, E), weight_hh (4H, H)
        "w_ih_f": u(ks[1], (4 * H, E), 0.1),
        "w_hh_f": u(ks[2], (4 * H, H), 0.1),
        "b_ih_f": u(ks[3], (4 * H,),   0.1),
        "b_hh_f": u(ks[4], (4 * H,),   0.1),
        "w_ih_b": u(ks[5], (4 * H, E), 0.1),
        "w_hh_b": u(ks[6], (4 * H, H), 0.1),
        "b_ih_b": u(ks[7], (4 * H,),   0.1),
        "b_hh_b": u(ks[8], (4 * H,),   0.1),
        "init_h": u(ks[9],  (2, H), 0.01),          # torch.nn.init.uniform_(-0.01, 0.01)
        "init_c": u(ks[10], (2, H), 0.01),
    }

    # c1: two sequences, padded to T1; lengths [8, 5]
    c1_tokens = jax.random.randint(ks[11], (B, T1), 1, VOCAB, dtype=jnp.int32)
    c1_lens = jnp.array([8, 5], dtype=jnp.int32)
    c1_tokens = c1_tokens * (jnp.arange(T1)[None, :] < c1_lens[:, None])  # pad = 0

    # c2: two sequences, padded to T2; lengths [6, 3]
    c2_tokens = jax.random.randint(ks[12], (B, T2), 1, VOCAB, dtype=jnp.int32)
    c2_lens = jnp.array([6, 3], dtype=jnp.int32)
    c2_tokens = c2_tokens * (jnp.arange(T2)[None, :] < c2_lens[:, None])  # pad = 0

    out = smm_p_forward(params, c1_tokens, c1_lens, c2_tokens, c2_lens)
    out = jax.block_until_ready(out)

    ref = jax.block_until_ready(
        _ref_smm_p(params, c1_tokens, c1_lens, c2_tokens, c2_lens))

    assert out.shape == (B, 2 * H), out.shape
    assert bool(jnp.all(jnp.isfinite(out)))
    # Tolerance accommodates default (bf16-operand / f32-accumulate) MXU
    # precision in the kernel vs. the HIGHEST-precision f32 reference.
    assert bool(jnp.allclose(out, ref, atol=5e-3, rtol=5e-3)), (
        float(jnp.max(jnp.abs(out - ref))))

    print("KERNEL_OK")
</pallas_src>

<mosaic_0001>
module attributes {stable_mosaic.version = 11 : i64} {
  func.func @smm_p_kernel(%arg0: memref<64x16xf32, #tpu.memory_space<vmem>>, %arg1: memref<8x1xi32, #tpu.memory_space<vmem>>, %arg2: memref<16x256xf32, #tpu.memory_space<vmem>>, %arg3: memref<32x128xf32, #tpu.memory_space<vmem>>, %arg4: memref<32x128xf32, #tpu.memory_space<vmem>>, %arg5: memref<1x256xf32, #tpu.memory_space<vmem>>, %arg6: memref<2x32xf32, #tpu.memory_space<vmem>>, %arg7: memref<2x32xf32, #tpu.memory_space<vmem>>, %arg8: memref<2x64xf32, #tpu.memory_space<vmem>>, %arg9: memref<64x256xf32, #tpu.memory_space<vmem>>) attributes {dimension_semantics = [], scalar_prefetch = 0 : i64, scratch_operands = 1 : i64, tpu.core_type = #tpu.core_type<tc>} {
    %c0 = arith.constant 0 : index
    %c0_0 = arith.constant 0 : index
    %0 = vector.load %arg0[%c0, %c0_0] : memref<64x16xf32, #tpu.memory_space<vmem>>, vector<64x16xf32>
    %c0_1 = arith.constant 0 : index
    %c0_2 = arith.constant 0 : index
    %1 = vector.load %arg2[%c0_1, %c0_2] : memref<16x256xf32, #tpu.memory_space<vmem>>, vector<16x256xf32>
    %cst = arith.constant dense<0.000000e+00> : vector<64x256xf32>
    %2 = tpu.matmul %0, %1, %cst {dimension_numbers = #tpu.dot_dimension_numbers<[1], [0], [0], [1], [0, 0, 1, 1], [], []>} : vector<64x16xf32>, vector<16x256xf32>, vector<64x256xf32> -> vector<64x256xf32>
    %c0_3 = arith.constant 0 : index
    %c0_4 = arith.constant 0 : index
    %3 = vector.load %arg5[%c0_3, %c0_4] : memref<1x256xf32, #tpu.memory_space<vmem>>, vector<1x256xf32>
    %4 = vector.broadcast %3 : vector<1x256xf32> to vector<64x256xf32>
    %5 = arith.addf %2, %4 : vector<64x256xf32>
    %c0_5 = arith.constant 0 : index
    %c0_6 = arith.constant 0 : index
    %6 = vector.load %arg9[%c0_5, %c0_6] : memref<64x256xf32, #tpu.memory_space<vmem>>, vector<64x256xf32>
    tpu.vector_store %arg9[%c0_5, %c0_6], %5 {strides = array<i32>} : memref<64x256xf32, #tpu.memory_space<vmem>>, vector<64x256xf32>,
    %c0_7 = arith.constant 0 : index
    %c0_8 = arith.constant 0 : index
    %7 = vector.load %arg3[%c0_7, %c0_8] : memref<32x128xf32, #tpu.memory_space<vmem>>, vector<32x128xf32>
    %c0_9 = arith.constant 0 : index
    %c0_10 = arith.constant 0 : index
    %8 = vector.load %arg4[%c0_9, %c0_10] : memref<32x128xf32, #tpu.memory_space<vmem>>, vector<32x128xf32>
    %c0_11 = arith.constant 0 : index
    %c0_12 = arith.constant 0 : index
    %9 = vector.load %arg1[%c0_11, %c0_12] : memref<8x1xi32, #tpu.memory_space<vmem>>, vector<8x1xi32>
    %c0_13 = arith.constant 0 : index
    %c0_14 = arith.constant 0 : index
    %10 = vector.load %arg6[%c0_13, %c0_14] : memref<2x32xf32, #tpu.memory_space<vmem>>, vector<1x32xf32>
    %11 = vector.shape_cast %10 : vector<1x32xf32> to vector<1x32xf32>
    %12 = vector.broadcast %11 : vector<1x32xf32> to vector<8x32xf32>
    %c0_15 = arith.constant 0 : index
    %c0_16 = arith.constant 0 : index
    %13 = vector.load %arg7[%c0_15, %c0_16] : memref<2x32xf32, #tpu.memory_space<vmem>>, vector<1x32xf32>
    %14 = vector.shape_cast %13 : vector<1x32xf32> to vector<1x32xf32>
    %15 = vector.broadcast %14 : vector<1x32xf32> to vector<8x32xf32>
    %c1 = arith.constant 1 : index
    %c0_17 = arith.constant 0 : index
    %16 = vector.load %arg6[%c1, %c0_17] : memref<2x32xf32, #tpu.memory_space<vmem>>, vector<1x32xf32>
    %17 = vector.shape_cast %16 : vector<1x32xf32> to vector<1x32xf32>
    %18 = vector.broadcast %17 : vector<1x32xf32> to vector<8x32xf32>
    %c1_18 = arith.constant 1 : index
    %c0_19 = arith.constant 0 : index
    %19 = vector.load %arg7[%c1_18, %c0_19] : memref<2x32xf32, #tpu.memory_space<vmem>>, vector<1x32xf32>
    %20 = vector.shape_cast %19 : vector<1x32xf32> to vector<1x32xf32>
    %21 = vector.broadcast %20 : vector<1x32xf32> to vector<8x32xf32>
    %cst_20 = arith.constant -9.99999984E+17 : f32
    %22 = vector.broadcast %cst_20 : f32 to vector<8x32xf32>
    %cst_21 = arith.constant -9.99999984E+17 : f32
    %c0_i32 = arith.constant 0 : i32
    %c8_i32 = arith.constant 8 : i32
    %23 = arith.addi %c0_i32, %c8_i32 : i32
    %c1_i32 = arith.constant 1 : i32
    %24:6 = scf.for %arg10 = %c0_i32 to %23 step %c1_i32 iter_args(%arg11 = %12, %arg12 = %15, %arg13 = %22, %arg14 = %18, %arg15 = %21, %arg16 = %22) -> (vector<8x32xf32>, vector<8x32xf32>, vector<8x32xf32>, vector<8x32xf32>, vector<8x32xf32>, vector<8x32xf32>)  : i32 {
      %c7_i32 = arith.constant 7 : i32
      %33 = arith.subi %c7_i32, %arg10 : i32
      %c8_i32_26 = arith.constant 8 : i32
      %34 = arith.muli %arg10, %c8_i32_26 : i32
      %35 = tpu.assume_multiple %34, 8 : i32
      %c8_i32_27 = arith.constant 8 : i32
      %36 = arith.muli %33, %c8_i32_27 : i32
      %37 = tpu.assume_multiple %36, 8 : i32
      %38 = arith.index_cast %35 : i32 to index
      %c0_28 = arith.constant 0 : index
      %39 = vector.load %arg9[%38, %c0_28] : memref<64x256xf32, #tpu.memory_space<vmem>>, vector<8x256xf32>
      %40 = arith.index_cast %37 : i32 to index
      %c0_29 = arith.constant 0 : index
      %41 = vector.load %arg9[%40, %c0_29] : memref<64x256xf32, #tpu.memory_space<vmem>>, vector<8x256xf32>
      %42 = vector.extract_strided_slice %39 {offsets = [0, 0], sizes = [8, 128], strides = [1, 1]} : vector<8x256xf32> to vector<8x128xf32>
      %cst_30 = arith.constant dense<0.000000e+00> : vector<8x128xf32>
      %43 = tpu.matmul %arg11, %7, %cst_30 {dimension_numbers = #tpu.dot_dimension_numbers<[1], [0], [0], [1], [0, 0, 1, 1], [], []>} : vector<8x32xf32>, vector<32x128xf32>, vector<8x128xf32> -> vector<8x128xf32>
      %44 = arith.addf %42, %43 : vector<8x128xf32>
      %45 = vector.extract_strided_slice %41 {offsets = [0, 128], sizes = [8, 128], strides = [1, 1]} : vector<8x256xf32> to vector<8x128xf32>
      %cst_31 = arith.constant dense<0.000000e+00> : vector<8x128xf32>
      %46 = tpu.matmul %arg14, %8, %cst_31 {dimension_numbers = #tpu.dot_dimension_numbers<[1], [0], [0], [1], [0, 0, 1, 1], [], []>} : vector<8x32xf32>, vector<32x128xf32>, vector<8x128xf32> -> vector<8x128xf32>
      %47 = arith.addf %45, %46 : vector<8x128xf32>
      %48 = vector.extract_strided_slice %44 {offsets = [0, 0], sizes = [8, 32], strides = [1, 1]} : vector<8x128xf32> to vector<8x32xf32>
      %49 = arith.negf %48 : vector<8x32xf32>
      %50 = math.exp %49 : vector<8x32xf32>
      %cst_32 = arith.constant 1.000000e+00 : f32
      %51 = vector.broadcast %cst_32 : f32 to vector<8x32xf32>
      %52 = arith.addf %51, %50 : vector<8x32xf32>
      %53 = arith.divf %51, %52 : vector<8x32xf32>
      %54 = vector.extract_strided_slice %44 {offsets = [0, 32], sizes = [8, 32], strides = [1, 1]} : vector<8x128xf32> to vector<8x32xf32>
      %55 = arith.negf %54 : vector<8x32xf32>
      %56 = math.exp %55 : vector<8x32xf32>
      %cst_33 = arith.constant 1.000000e+00 : f32
      %57 = vector.broadcast %cst_33 : f32 to vector<8x32xf32>
      %58 = arith.addf %57, %56 : vector<8x32xf32>
      %59 = arith.divf %57, %58 : vector<8x32xf32>
      %60 = vector.extract_strided_slice %44 {offsets = [0, 64], sizes = [8, 32], strides = [1, 1]} : vector<8x128xf32> to vector<8x32xf32>
      %61 = math.tanh %60 : vector<8x32xf32>
      %62 = vector.extract_strided_slice %44 {offsets = [0, 96], sizes = [8, 32], strides = [1, 1]} : vector<8x128xf32> to vector<8x32xf32>
      %63 = arith.negf %62 : vector<8x32xf32>
      %64 = math.exp %63 : vector<8x32xf32>
      %cst_34 = arith.constant 1.000000e+00 : f32
      %65 = vector.broadcast %cst_34 : f32 to vector<8x32xf32>
      %66 = arith.addf %65, %64 : vector<8x32xf32>
      %67 = arith.divf %65, %66 : vector<8x32xf32>
      %68 = arith.mulf %59, %arg12 : vector<8x32xf32>
      %69 = arith.mulf %53, %61 : vector<8x32xf32>
      %70 = arith.addf %68, %69 : vector<8x32xf32>
      %71 = math.tanh %70 : vector<8x32xf32>
      %72 = arith.mulf %67, %71 : vector<8x32xf32>
      %73 = vector.extract_strided_slice %47 {offsets = [0, 0], sizes = [8, 32], strides = [1, 1]} : vector<8x128xf32> to vector<8x32xf32>
      %74 = arith.negf %73 : vector<8x32xf32>
      %75 = math.exp %74 : vector<8x32xf32>
      %cst_35 = arith.constant 1.000000e+00 : f32
      %76 = vector.broadcast %cst_35 : f32 to vector<8x32xf32>
      %77 = arith.addf %76, %75 : vector<8x32xf32>
      %78 = arith.divf %76, %77 : vector<8x32xf32>
      %79 = vector.extract_strided_slice %47 {offsets = [0, 32], sizes = [8, 32], strides = [1, 1]} : vector<8x128xf32> to vector<8x32xf32>
      %80 = arith.negf %79 : vector<8x32xf32>
      %81 = math.exp %80 : vector<8x32xf32>
      %cst_36 = arith.constant 1.000000e+00 : f32
      %82 = vector.broadcast %cst_36 : f32 to vector<8x32xf32>
      %83 = arith.addf %82, %81 : vector<8x32xf32>
      %84 = arith.divf %82, %83 : vector<8x32xf32>
      %85 = vector.extract_strided_slice %47 {offsets = [0, 64], sizes = [8, 32], strides = [1, 1]} : vector<8x128xf32> to vector<8x32xf32>
      %86 = math.tanh %85 : vector<8x32xf32>
      %87 = vector.extract_strided_slice %47 {offsets = [0, 96], sizes = [8, 32], strides = [1, 1]} : vector<8x128xf32> to vector<8x32xf32>
      %88 = arith.negf %87 : vector<8x32xf32>
      %89 = math.exp %88 : vector<8x32xf32>
      %cst_37 = arith.constant 1.000000e+00 : f32
      %90 = vector.broadcast %cst_37 : f32 to vector<8x32xf32>
      %91 = arith.addf %90, %89 : vector<8x32xf32>
      %92 = arith.divf %90, %91 : vector<8x32xf32>
      %93 = arith.mulf %84, %arg15 : vector<8x32xf32>
      %94 = arith.mulf %78, %86 : vector<8x32xf32>
      %95 = arith.addf %93, %94 : vector<8x32xf32>
      %96 = math.tanh %95 : vector<8x32xf32>
      %97 = arith.mulf %92, %96 : vector<8x32xf32>
      %98 = vector.broadcast %arg10 : i32 to vector<8x1xi32>
      %99 = arith.cmpi slt, %98, %9 : vector<8x1xi32>
      %100 = vector.broadcast %33 : i32 to vector<8x1xi32>
      %101 = arith.cmpi slt, %100, %9 : vector<8x1xi32>
      %102 = vector.shape_cast %99 : vector<8x1xi1> to vector<8x1xi1>
      %103 = vector.broadcast %102 : vector<8x1xi1> to vector<8x32xi1>
      %104 = arith.select %103, %72, %arg11 : vector<8x32xi1>, vector<8x32xf32>
      %105 = vector.shape_cast %99 : vector<8x1xi1> to vector<8x1xi1>
      %106 = vector.broadcast %105 : vector<8x1xi1> to vector<8x32xi1>
      %107 = arith.select %106, %70, %arg12 : vector<8x32xi1>, vector<8x32xf32>
      %108 = vector.shape_cast %101 : vector<8x1xi1> to vector<8x1xi1>
      %109 = vector.broadcast %108 : vector<8x1xi1> to vector<8x32xi1>
      %110 = arith.select %109, %97, %arg14 : vector<8x32xi1>, vector<8x32xf32>
      %111 = vector.shape_cast %101 : vector<8x1xi1> to vector<8x1xi1>
      %112 = vector.broadcast %111 : vector<8x1xi1> to vector<8x32xi1>
      %113 = arith.select %112, %95, %arg15 : vector<8x32xi1>, vector<8x32xf32>
      %114 = vector.shape_cast %99 : vector<8x1xi1> to vector<8x1xi1>
      %115 = vector.broadcast %114 : vector<8x1xi1> to vector<8x32xi1>
      %116 = vector.broadcast %cst_21 : f32 to vector<8x32xf32>
      %117 = arith.select %115, %72, %116 : vector<8x32xi1>, vector<8x32xf32>
      %118 = arith.maximumf %arg13, %117 : vector<8x32xf32>
      %119 = vector.shape_cast %101 : vector<8x1xi1> to vector<8x1xi1>
      %120 = vector.broadcast %119 : vector<8x1xi1> to vector<8x32xi1>
      %121 = vector.broadcast %cst_21 : f32 to vector<8x32xf32>
      %122 = arith.select %120, %97, %121 : vector<8x32xi1>, vector<8x32xf32>
      %123 = arith.maximumf %arg16, %122 : vector<8x32xf32>
      scf.yield %104, %107, %118, %110, %113, %123 : vector<8x32xf32>, vector<8x32xf32>, vector<8x32xf32>, vector<8x32xf32>, vector<8x32xf32>, vector<8x32xf32>
    }
    %c8_i32_22 = arith.constant 8 : i32
    %25 = vector.extract_strided_slice %24#2 {offsets = [0, 0], sizes = [2, 32], strides = [1, 1]} : vector<8x32xf32> to vector<2x32xf32>
    %26 = vector.extract_strided_slice %24#2 {offsets = [2, 0], sizes = [2, 32], strides = [1, 1]} : vector<8x32xf32> to vector<2x32xf32>
    %27 = arith.maximumf %25, %26 : vector<2x32xf32>
    %c0_23 = arith.constant 0 : index
    %c0_24 = arith.constant 0 : index
    %28 = vector.load %arg8[%c0_23, %c0_24] : memref<2x64xf32, #tpu.memory_space<vmem>>, vector<2x32xf32>
    tpu.vector_store %arg8[%c0_23, %c0_24], %27 {strides = array<i32>} : memref<2x64xf32, #tpu.memory_space<vmem>>, vector<2x32xf32>,
    %29 = vector.extract_strided_slice %24#5 {offsets = [0, 0], sizes = [2, 32], strides = [1, 1]} : vector<8x32xf32> to vector<2x32xf32>
    %30 = vector.extract_strided_slice %24#5 {offsets = [2, 0], sizes = [2, 32], strides = [1, 1]} : vector<8x32xf32> to vector<2x32xf32>
    %31 = arith.maximumf %29, %30 : vector<2x32xf32>
    %c0_25 = arith.constant 0 : index
    %c32 = arith.constant 32 : index
    %32 = vector.load %arg8[%c0_25, %c32] : memref<2x64xf32, #tpu.memory_space<vmem>>, vector<2x32xf32>
    tpu.vector_store %arg8[%c0_25, %c32], %31 {strides = array<i32>} : memref<2x64xf32, #tpu.memory_space<vmem>>, vector<2x32xf32>,
    return
  }
}

</mosaic_0001>

<bundles_post_ra>
// kernel: tpu_custom_call.1
= control target key start
LH: loop header
LB: loop body
LE: loop exit
PB: predicated region body
PF: predicated region fallthrough
CT: control target
= control target key end

     0   :  { %13 = vsyncpa [#allocation4], 0  ;;  %v813_v5 = vmov 0.0   ;;  %vm54_vm0 = vcmask 130048   ;;  %v44_v28 = vlaneseq  ;;  %s1070_s0 = inlined_call_operand.vmem [shape: f32[64,16], index: 0, kind: input, shape index: {}]   ;;  %s1071_s1 = inlined_call_operand.vmem [shape: s32[8,1], index: 1, kind: input, shape index: {}]   ;;  %s1072_s2 = inlined_call_operand.vmem [shape: f32[16,256], index: 2, kind: input, shape index: {}]   ;;  %s1073_s3 = inlined_call_operand.vmem [shape: f32[32,128], index: 3, kind: input, shape index: {}]   ;;  %s1074_s4 = inlined_call_operand.vmem [shape: f32[32,128], index: 4, kind: input, shape index: {}]   ;;  %s1075_s5 = inlined_call_operand.vmem [shape: f32[1,256], index: 5, kind: input, shape index: {}]   ;;  %s1076_s6 = inlined_call_operand.vmem [shape: f32[2,32], index: 6, kind: input, shape index: {}]   ;;  %s1077_s7 = inlined_call_operand.vmem [shape: f32[2,32], index: 7, kind: input, shape index: {}]   ;;  %s1078_s8 = inlined_call_operand.hbm [shape: f32[2,64], index: 8, kind: output, shape index: {}]  }
   0x1   :  { %v39_v0 = vld [vmem:[%s1072_s2 + $0x8] sm:$0xff]  ;;  %v41_v1 = vld [vmem:[%s1072_s2 + $0x18] sm:$0xff]  ;;  %v38_v3 = vld [vmem:[%s1072_s2] sm:$0xff]  ;;  %143 = vmatprep.mubr.f32.mxu0 %v813_v5  ;;  %167 = vmatprep.mubr.f32.mxu1 %v813_v5 }
   0x2   :  { %v630_v2 = vpack.c.bf16 %v41_v1, %v39_v0  ;;  %v40_v4 = vld [vmem:[%s1072_s2 + $0x10] sm:$0xff]  ;;  %v30_v7 = vld [vmem:[%s1070_s0] sm:$0xff]  ;;  %v31_v9 = vld [vmem:[%s1070_s0 + $0x8] sm:$0xff]  ;;  %v45_v29 = vshrl.u32 %v44_v28, 7 }
   0x3   :  { %v632_v6 = vpack.c.bf16 %v40_v4, %v38_v3  ;;  %v34_v8 = vld [vmem:[%s1070_s0 + $0x20] sm:$0xff]  ;;  %v35_v10 = vld [vmem:[%s1070_s0 + $0x28] sm:$0xff]  ;;  %v32_v11 = vld [vmem:[%s1070_s0 + $0x10] sm:$0xff]  ;;  %v975_v3 = vmov -1e+18  }
   0x4   :  { %631 = vmatprep.subr.bf16.mxu0 %v630_v2  ;;  %646 = vmatprep.subr.bf16.mxu1 %v630_v2  ;;  %v36_v12 = vld [vmem:[%s1070_s0 + $0x30] sm:$0xff]  ;;  %v33_v13 = vld [vmem:[%s1070_s0 + $0x18] sm:$0xff]  ;;  %v916_v15 = vld [vmem:[%s1073_s3] sm:$0xff]  ;;  %v46_v30 = vsub.s32 0, %v45_v29  ;;  %v50_v32 = vsub.s32 1, %v45_v29 }
   0x5   :  { %633 = vmatpush1.bf16.msra.mxu0 %v632_v6  ;;  %647 = vmatpush1.bf16.msra.mxu1 %v632_v6  ;;  %v37_v14 = vld [vmem:[%s1070_s0 + $0x38] sm:$0xff]  ;;  %v921_v16 = vld [vmem:[%s1073_s3 + $0x8] sm:$0xff]  ;;  %v926_v17 = vld [vmem:[%s1073_s3 + $0x10] sm:$0xff]  ;;  %v981_v4 = vmov -1e+18  }
   0x6   :  { %v931_v18 = vld [vmem:[%s1073_s3 + $0x18] sm:$0xff]  ;;  %v936_v19 = vld [vmem:[%s1074_s4] sm:$0xff]  ;;  %v941_v20 = vld [vmem:[%s1074_s4 + $0x8] sm:$0xff] }
   0x7   :  { %v946_v21 = vld [vmem:[%s1074_s4 + $0x10] sm:$0xff]  ;;  %v951_v22 = vld [vmem:[%s1074_s4 + $0x18] sm:$0xff]  ;;  %v956_v23 = vld [vmem:[%s1071_s1] sm:$0xff] }
   0x8   :  { %574 = vmatmul.mubr.msk.f32.vlgmr.msra.gmra.mrb[0].mxu0 %vm54_vm0, %v30_v7  ;;  %578 = vmatmul.mubr.msk.f32.vlgmr.msra.gmra.mrb[0].mxu1 %vm54_vm0, %v34_v8  ;;  %v961_v24 = vld [vmem:[%s1076_s6] ss:$0 sm:$0xff]   ;;  %v584_v26 = vld [vmem:[%s1076_s6 + $0x1] ss:$0 sm:$0xff]  }
   0x9   :  { %149 = vmatprep.mubr.f32.mxu0 %v813_v5  ;;  %173 = vmatprep.mubr.f32.mxu1 %v813_v5  ;;  %v583_v25 = vld [vmem:[%s1077_s7] ss:$0 sm:$0xff]   ;;  %v585_v27 = vld [vmem:[%s1077_s7 + $0x1] ss:$0 sm:$0xff]  }
   0xa   :  { %v42_v31 = vld [vmem:[%s1075_s5] sm:$0x3]  ;;  %s988_s5 = smov 0  }
   0xb   :  { %v47_v33 = vrot.slane %v42_v31, %v46_v30  ;;  %v51_v34 = vrot.slane %v42_v31, %v50_v32 }
   0xc   :  { %575 = vmatmul.mubr.msk.f32.gmra.mrb[2].mxu0 %vm54_vm0, %v31_v9  ;;  %579 = vmatmul.mubr.msk.f32.gmra.mrb[2].mxu1 %vm54_vm0, %v35_v10 }
   0xd   :  { %155 = vmatprep.mubr.f32.mxu0 %v813_v5  ;;  %179 = vmatprep.mubr.f32.mxu1 %v813_v5 }
  0x10   :  { %576 = vmatmul.mubr.msk.f32.gmra.mrb[4].mxu0 %vm54_vm0, %v32_v11  ;;  %580 = vmatmul.mubr.msk.f32.gmra.mrb[4].mxu1 %vm54_vm0, %v36_v12 }
  0x11   :  { %161 = vmatprep.mubr.f32.mxu0 %v813_v5  ;;  %185 = vmatprep.mubr.f32.mxu1 %v813_v5 }
  0x14   :  { %577 = vmatmul.mubr.msk.f32.gmra.mrb[6].mxu0 %vm54_vm0, %v33_v13  ;;  %581 = vmatmul.mubr.msk.f32.gmra.mrb[6].mxu1 %vm54_vm0, %v37_v14 }
  0xdb   :  { %v145_v35 = vpop.f32.mrb[0].mxu0  ;;  %v169_v36 = vpop.f32.mrb[0].mxu1 }
  0xdc   :  { %v146_v37 = vadd.f32 %v145_v35, %v47_v33  ;;  %v170_v38 = vadd.f32 %v169_v36, %v47_v33  ;;  %v147_v39 = vpop.f32.mrb[1].mxu0  ;;  %v171_v40 = vpop.f32.mrb[1].mxu1 }
  0xdd   :  { %v148_v41 = vadd.f32 %v147_v39, %v51_v34  ;;  %v172_v42 = vadd.f32 %v171_v40, %v51_v34 }
  0xde   :  { %192 = vst [vmem:[#allocation2] sm:$0xff] %v146_v37  ;;  %200 = vst [vmem:[#allocation2 + $0x40] sm:$0xff] %v170_v38 }
  0xdf   :  { %193 = vst [vmem:[#allocation2 + $0x8] sm:$0xff] %v148_v41  ;;  %201 = vst [vmem:[#allocation2 + $0x48] sm:$0xff] %v172_v42  ;;  %v151_v43 = vpop.f32.mrb[2].mxu0  ;;  %v175_v44 = vpop.f32.mrb[2].mxu1 }
  0xe0   :  { %v152_v45 = vadd.f32 %v151_v43, %v47_v33  ;;  %v176_v46 = vadd.f32 %v175_v44, %v47_v33  ;;  %v153_v47 = vpop.f32.mrb[3].mxu0  ;;  %v177_v48 = vpop.f32.mrb[3].mxu1 }
  0xe1   :  { %v154_v49 = vadd.f32 %v153_v47, %v51_v34  ;;  %v178_v50 = vadd.f32 %v177_v48, %v51_v34 }
  0xe2   :  { %194 = vst [vmem:[#allocation2 + $0x10] sm:$0xff] %v152_v45  ;;  %202 = vst [vmem:[#allocation2 + $0x50] sm:$0xff] %v176_v46 }
  0xe3   :  { %195 = vst [vmem:[#allocation2 + $0x18] sm:$0xff] %v154_v49  ;;  %203 = vst [vmem:[#allocation2 + $0x58] sm:$0xff] %v178_v50  ;;  %v157_v51 = vpop.f32.mrb[4].mxu0  ;;  %v181_v52 = vpop.f32.mrb[4].mxu1 }
  0xe4   :  { %v158_v53 = vadd.f32 %v157_v51, %v47_v33  ;;  %v182_v54 = vadd.f32 %v181_v52, %v47_v33  ;;  %v159_v55 = vpop.f32.mrb[5].mxu0  ;;  %v183_v56 = vpop.f32.mrb[5].mxu1 }
  0xe5   :  { %v160_v57 = vadd.f32 %v159_v55, %v51_v34  ;;  %v184_v58 = vadd.f32 %v183_v56, %v51_v34 }
  0xe6   :  { %196 = vst [vmem:[#allocation2 + $0x20] sm:$0xff] %v158_v53  ;;  %204 = vst [vmem:[#allocation2 + $0x60] sm:$0xff] %v182_v54 }
  0xe7   :  { %197 = vst [vmem:[#allocation2 + $0x28] sm:$0xff] %v160_v57  ;;  %205 = vst [vmem:[#allocation2 + $0x68] sm:$0xff] %v184_v58  ;;  %v163_v59 = vpop.f32.mrb[6].mxu0  ;;  %v187_v60 = vpop.f32.mrb[6].mxu1 }
  0xe8   :  { %v164_v61 = vadd.f32 %v163_v59, %v47_v33  ;;  %v188_v62 = vadd.f32 %v187_v60, %v47_v33  ;;  %v165_v63 = vpop.f32.mrb[7].mxu0  ;;  %v189_v0 = vpop.f32.mrb[7].mxu1 }
  0xe9   :  { %v166_v1 = vadd.f32 %v165_v63, %v51_v34  ;;  %v190_v2 = vadd.f32 %v189_v0, %v51_v34 }
  0xea   :  { %198 = vst [vmem:[#allocation2 + $0x30] sm:$0xff] %v164_v61  ;;  %206 = vst [vmem:[#allocation2 + $0x70] sm:$0xff] %v188_v62 }
  0xeb   :  { %199 = vst [vmem:[#allocation2 + $0x38] sm:$0xff] %v166_v1  ;;  %207 = vst [vmem:[#allocation2 + $0x78] sm:$0xff] %v190_v2 }
  0xec LB: > { %v635_v5 = vpack.c.bf16 %v921_v16, %v916_v15  ;;  %v641_v6 = vpack.c.bf16 %v941_v20, %v936_v19  ;;  %v814_v7 = vmov 0.0|0.0   ;;  %v638_v8 = vpack.c.bf16 %v931_v18, %v926_v17  ;;  %s817_s6 = smov 32   ;;  %s249_s7 = ssub.s32 7, %s811_s5  ;;  %s811_s5 = sphi %s988_s5, %s242_s5   ;;  %v807_v24 = vphi %v961_v24, %v499_v24   ;;  %v803_v25 = vphi %v583_v25, %v503_v25   ;;  %v799_v4 = vphi %v981_v4, %v1080_v4   ;;  %v795_v26 = vphi %v584_v26, %v507_v26   ;;  %v791_v27 = vphi %v585_v27, %v511_v27   ;;  %v787_v3 = vphi %v975_v3, %v1079_v3  }
  0xed   : > { %634 = vmatprep.subr.bf16.mxu0 %v814_v7  ;;  %640 = vmatprep.subr.bf16.mxu1 %v814_v7  ;;  %v644_v9 = vpack.c.bf16 %v951_v22, %v946_v21  ;;  %vm815_vm1 = vmmov 0   ;;  %v816_v10 = vmov 0.0   ;;  %vm264_vm2 = vcmask 261120   ;;  %s586_s29 = sshll.u32 %s811_s5, 3  ;;  %s587_s30 = sshll.u32 %s249_s7, 3 }
  0xee   : > { %636 = vmatpush3.bf16.msra.mxu0 %v635_v5  ;;  %642 = vmatpush3.bf16.msra.mxu1 %v641_v6  ;;  %s252_s9 = sshra.s32 %s586_s29, 3  ;;  %s258_s10 = sshra.s32 %s587_s30, 3  ;;  %v469_v39 = vstv %s811_s5  ;;  %v471_v43 = vstv %s249_s7 }
  0xef   : > { %637 = vmatprep.subr.bf16.mxu0 %v814_v7  ;;  %616 = vmatprep.mubr.msk.f32.mxu0 %vm815_vm1, %v816_v10  ;;  %s596_s11 = sshll.u32 %s252_s9, 4  ;;  %s597_s0 = sshll.u32 %s258_s10, 4  ;;  %vm470_vm3 = vcmp.lt.s32.totalorder %v469_v39, %v956_v23  ;;  %vm472_vm4 = vcmp.lt.s32.totalorder %v471_v43, %v956_v23 }
  0xf0   : > { %643 = vmatprep.subr.bf16.mxu1 %v814_v7  ;;  %627 = vmatprep.mubr.msk.f32.mxu1 %vm815_vm1, %v816_v10  ;;  %s256_s12 = scalar_lea.vmem [#allocation2], %s596_s11  ;;  %s262_s13 = scalar_lea.vmem [#allocation2], %s597_s0 }
  0xf1   : > { %421 = vrot.lane.b32.xlu1 %v803_v25, %s817_s6  ;;  %s819_s14 = smov 64   ;;  %s820_s15 = smov 96  }
  0xf2   : > { %639 = vmatpush3.bf16.msra.mxu0 %v638_v8  ;;  %645 = vmatpush3.bf16.msra.mxu1 %v644_v9  ;;  %v257_v11 = vld [vmem:[%s256_s12] sm:$0xff]  ;;  %v263_v12 = vld [vmem:[%s262_s13 + $0x8] sm:$0xff]  ;;  %s242_s5 = sadd.s32 1, %s811_s5  }
  0xf3   : > { %p239_p0 = scmp.ge.s32.totalorder %s242_s5, 8  }
  0xf4   :  { %s821_s16 = smov (%p239_p0), 32   ;;  %s822_s2 = smov (%p239_p0), 64   ;;  %vm521_vm7 = vcmask (%p239_p0), 254976   ;;  %vm531_vm8 = vcmask (%p239_p0), 517376  }
  0xf5   : > { %617 = vmatmul.mubr.msk.f32.vlgmr.msra.gmra.mrb[0].mxu0 %vm264_vm2, %v807_v24  ;;  %628 = vmatmul.mubr.msk.f32.vlgmr.msra.gmra.mrb[0].mxu1 %vm264_vm2, %v795_v26  ;;  %s823_s17 = smov (%p239_p0), [#allocation3]  }
  0xf6   : > { %449 = vrot.lane.b32.xlu1 %v791_v27, %s817_s6  ;;  %v818_v27 = vmov 0   ;;  %s539_s18 = sshll.u32 (%p239_p0), %s823_s17, 4  ;;  %s540_s18 = int_to_ptr.vmem [resolvable:$true] %s539_s18 }
  0xf7   : > { %715 = vset.pattern.permute.xlu0 %v818_v27  ;;  %716 = vset.pattern.permute.xlu1 %v818_v27  ;;  %v473_v46 = vsel %vm470_vm3, 1, %v818_v27  ;;  %v483_v48 = vsel %vm472_vm4, 1, %v818_v27  ;;  %s733_s19 = scalar_lea.vmem (%p239_p0), %s540_s18, 32  ;;  %p738_p2 = scmp.lt.s32.totalorder (%p239_p0), %s540_s18, %s540_s18 }
  0xf8   :  { %p734_p1 = scmp.ne.s32.totalorder (%p239_p0), %s540_s18, %s733_s19  ;;  %p739_p3 = scmp.lt.s32.totalorder (%p239_p0), %s733_s19, %s733_s19 }
  0xfa   :  { %p740_p4 = por (%p239_p0), %p739_p3, %p738_p2 }
  0xfc   :  { %p741_p5 = pnand (%p239_p0), %p740_p4, %p734_p1 }
 0x163   : > { %v422_v49 = vpop.permute.xlu1 %421 }
 0x168   : > { %v450_v51 = vpop.permute.xlu1 %449 }
 0x1c8   : > { %v334_v13 = vpop.f32.mrb[0].mxu0  ;;  %v408_v14 = vpop.f32.mrb[0].mxu1 }
 0x1c9   : > { %v338_v25 = vadd.f32 %v334_v13, %v257_v11  ;;  %v618_v28 = vpop.f32.mrb[1].mxu0  ;;  %v412_v29 = vadd.f32 %v408_v14, %v263_v12  ;;  %v629_v30 = vpop.f32.mrb[1].mxu1 }
 0x1cb   : > { %717 = vtanh.f32 %v338_v25  ;;  %v594_v33 = vmul.f32 -1.442695, %v338_v25  ;;  %v595_v34 = vmul.f32 -1.442695, %v412_v29 }
 0x1cc   : > { %719 = vtanh.f32 %v412_v29 }
 0x1cd   : > { %721 = vpow2.f32 %v594_v33 }
 0x1ce   : > { %723 = vpow2.f32 %v595_v34 }
 0x1d5   : > { %v718_v31 = vpop.eup %717 }
 0x1d6   : > { %426 = vrot.lane.b32.xlu0 %v718_v31, %s819_s14  ;;  %v720_v32 = vpop.eup %719 }
 0x1d7   : > { %v722_v35 = vpop.eup %721 }
 0x1d8   : > { %v416_v36 = vadd.f32 1.0, %v722_v35  ;;  %v724_v37 = vpop.eup %723 }
 0x1d9   : > { %v444_v38 = vadd.f32 1.0, %v724_v37 }
 0x1da   : > { %454 = vrot.lane.b32.xlu0 %v720_v32, %s819_s14  ;;  %725 = vrcp.f32 %v416_v36 }
 0x1db   : > { %727 = vrcp.f32 %v444_v38 }
 0x1e4   : > { %v726_v40 = vpop.eup %725 }
 0x1e5   : > { %v728_v44 = vpop.eup %727  ;;  %v424_v50 = vmul.f32 %v726_v40, %v422_v49 }
 0x1e6   : > { %v452_v54 = vmul.f32 %v728_v44, %v450_v51 }
 0x248   : > { %v427_v41 = vpop.permute.xlu0 %426 }
 0x249   : > { %v429_v42 = vmul.f32 %v726_v40, %v427_v41 }
 0x24b   : > { %431 = vrot.lane.b32.xlu0 %v429_v42, %s817_s6 }
 0x24c   : > { %v455_v45 = vpop.permute.xlu0 %454 }
 0x24d   : > { %v457_v47 = vmul.f32 %v728_v44, %v455_v45 }
 0x24f   : > { %475 = vperm.xlu0 %715, %v473_v46   ;;  %459 = vrot.lane.b32.xlu1 %v457_v47, %s817_s6 }
 0x253   : > { %485 = vperm.xlu1 %716, %v483_v48  }
 0x2bd   : > { %v432_v52 = vpop.permute.xlu0 %431 }
 0x2be   : > { %v434_v53 = vadd.f32 %v432_v52, %v424_v50 }
 0x2c0   : > { %729 = vtanh.f32 %v434_v53 }
 0x2c1   : > { %v460_v55 = vpop.permute.xlu1 %459 }
 0x2c2   : > { %v462_v56 = vadd.f32 %v460_v55, %v452_v54 }
 0x2c4   : > { %731 = vtanh.f32 %v462_v56 }
 0x2ca   : > { %v730_v57 = vpop.eup %729 }
 0x2cb   : > { %437 = vrot.lane.b32.xlu1 %v730_v57, %s819_s14 }
 0x2ce   : > { %v732_v58 = vpop.eup %731  ;;  %v476_v59 = vpop.permute.xlu0 %475 }
 0x2cf   : > { %478 = vrot.lane.b32.xlu1 %v807_v24, %s820_s15  ;;  %465 = vrot.lane.b32.xlu0 %v732_v58, %s819_s14  ;;  %vm477_vm5 = vcmp.eq.s32.totalorder %v476_v59, 1 }
 0x2d0   : > { %v482_v61 = vsel %vm477_vm5, %v434_v53, %v422_v49 }
 0x2d2   : > { %v486_v60 = vpop.permute.xlu1 %485 }
 0x2d3   : > { %488 = vrot.lane.b32.xlu0 %v795_v26, %s820_s15  ;;  %vm487_vm6 = vcmp.eq.s32.totalorder %v486_v60, 1 }
 0x2d4   : > { %v492_v62 = vsel %vm487_vm6, %v462_v56, %v450_v51 }
 0x2d7   : > { %502 = vrot.lane.b32.xlu0 %v482_v61, %s820_s15 }
 0x2db   : > { %510 = vrot.lane.b32.xlu0 %v492_v62, %s820_s15 }
 0x33d   : > { %v438_v63 = vpop.permute.xlu1 %437 }
 0x33e   : > { %v440_v0 = vmul.f32 %v726_v40, %v438_v63 }
 0x340   : > { %v493_v1 = vsel %vm477_vm5, %v440_v0, -1e+18 }
 0x341   : > { %v494_v2 = vmax.f32 %v799_v4, %v493_v1   ;;  %v466_v5 = vpop.permute.xlu0 %465  ;;  %v479_v24 = vpop.permute.xlu1 %478 }
 0x342   : > { %v468_v6 = vmul.f32 %v728_v44, %v466_v5  ;;  %v481_v7 = vsel %vm477_vm5, %v440_v0, %v479_v24 }
 0x343   : > { %498 = vrot.lane.b32.xlu1 %v481_v7, %s817_s6  ;;  %v1080_v4 = vmov %v494_v2  ;;  %v514_v11 = vrot.slane (%p239_p0), %v494_v2, 2 }
 0x344   : > { %v495_v26 = vsel %vm487_vm6, %v468_v6, -1e+18 }
 0x345   : > { %v496_v8 = vmax.f32 %v787_v3, %v495_v26   ;;  %v489_v9 = vpop.permute.xlu0 %488  ;;  %v516_v13 = vmax.f32 (%p239_p0), %v494_v2, %v514_v11 }
 0x346   : > { %v491_v10 = vsel %vm487_vm6, %v468_v6, %v489_v9 }
 0x347   : > { %506 = vrot.lane.b32.xlu1 %v491_v10, %s817_s6  ;;  %v1079_v3 = vmov %v496_v8  ;;  %v524_v12 = vrot.slane (%p239_p0), %v496_v8, 2  ;;  %518 = vrot.lane.b32.xlu0 (%p239_p0), %v516_v13, %s821_s16 }
 0x349   : > { %v503_v25 = vpop.permute.xlu0 %502   ;;  %v526_v14 = vmax.f32 (%p239_p0), %v496_v8, %v524_v12 }
 0x34b   :  { %528 = vrot.lane.b32.xlu0 (%p239_p0), %v526_v14, %s822_s2 }
 0x34d   : > { %v511_v27 = vpop.permute.xlu0 %510  }
 0x3b3   :  { %241 = sbr.rel (!%p239_p0) target bundleno = 236 (0xec), region = 61 }
 0x3b5   : > { %v499_v24 = vpop.permute.xlu1 %498  }
 0x3b9   : > { %v507_v26 = vpop.permute.xlu1 %506   ;;  %v519_v28 = vpop.permute.xlu0 (%p239_p0), %518 }
 0x3ba   :  { %522 = vst.msk [vmem:[#allocation3] sm:$0x3] %vm521_vm7, %v519_v28 }
 0x3bd   :  { %v529_v29 = vpop.permute.xlu0 %528 }
 0x3be   :  { %532 = vst.msk [vmem:[#allocation3] sm:$0x3] %vm531_vm8, %v529_v29 }
 0x3bf   :  { %744 = shalt.err (!%p741_p5)
}
 0x3c0   :  { %s745_s21 = scalar_lea.hbm %s1078_s8, 32 }
 0x3c1   :  { %p746_p6 = scmp.ne.s32.totalorder %s1078_s8, %s745_s21  ;;  %p749_p7 = scmp.lt.u32.totalorder %s745_s21, %s1078_s8 }
 0x3c3   :  { %p751_p8 = pnand %p749_p7, %p746_p6 }
 0x3c5   :  { %754 = shalt.err (!%p751_p8)
}
 0x3c6   :  { %542 = dma.vmem_to_hbm [thread:$0]  %s540_s18, 32, %s1078_s8, [#allocation4]  }
 0x3c7   :  { %783 = dma.done.wait [#allocation4], 32  }
 0x3c8   :  { %784 = vsyncadd [#allocation4], 4294967264 }
 0x3c9   :  { %546 = vsyncpa [#allocation4], 1 }

</bundles_post_ra>
